<compile_context>
chip_gen: v6e
topology: v6e:2x2x1
jax: 0.10.0
libtpu: 0.0.40
codegen_flags: <defaults>
</compile_context>

<pallas_src>
import math
import numpy as np
import jax
import jax.numpy as jnp
from jax import lax
from jax.experimental import pallas as pl
from jax.experimental.pallas import tpu as pltpu


_ROLL_CONVENTION_CACHE = None


def _roll_matches_numpy():
    """Probe pltpu.roll's rotation direction once (trace time, cached).

    Returns True if pltpu.roll(x, k, axis)[i] == x[(i - k) % n] (np.roll convention),
    False for the inverse.  Raises if neither matches (a silent wrong default would
    flip the local-conv taps).
    """
    global _ROLL_CONVENTION_CACHE
    if _ROLL_CONVENTION_CACHE is None:
        x = np.arange(8 * 128, dtype=np.float32).reshape(8, 128)

        def probe(x_ref, o_ref):
            o_ref[...] = pltpu.roll(x_ref[...], 1, axis=1)

        out = np.asarray(jax.block_until_ready(
            pl.pallas_call(
                probe, out_shape=jax.ShapeDtypeStruct((8, 128), jnp.float32),
            )(jnp.asarray(x))))
        if np.array_equal(out, np.roll(x, 1, axis=1)):
            _ROLL_CONVENTION_CACHE = True
        elif np.array_equal(out, np.roll(x, -1, axis=1)):
            _ROLL_CONVENTION_CACHE = False
        else:
            raise RuntimeError(
                "pltpu.roll probe matched neither rotation convention")
    return _ROLL_CONVENTION_CACHE


def _choose_group(B, HW, C, vmem_block_budget_bytes=12 * 1024 * 1024):
    """Batches folded into one grid step.

    Constraints (per perf review):
      * grid length >= 2 whenever B >= 2 (pipelining + v7x dual-TC), so G <= B // 2;
      * double-buffered f32 in+out blocks stay within a conservative VMEM budget
        (~12 MiB), leaving headroom for the 512 KiB bf16 w2 block and the in-kernel
        (G*25, 512) f32 temporaries under the 32 MiB default scoped limit (v7x has
        only 64 MiB physical VMEM).
    Within those, G is maximised so the conv2 matmul gets M = G*25 rows.
    """
    def fits(G):
        return 2 * 2 * G * HW * C * 4 <= vmem_block_budget_bytes  # dbl-buffered in+out

    max_g = max(1, B // 2)
    best = 1
    for G in range(1, max_g + 1):
        if B % G == 0 and fits(G):
            best = G
    return best


def make_mcca_kernel(w1, C, P, G, local_weight, roll_is_numpy):
    w1 = [float(v) for v in np.asarray(w1).reshape(-1)]
    K = len(w1)
    pad = (K - 1) // 2
    R = G * P                      # pooled rows per block (G batches x L*L windows)

    def lane_take(arr, delta):
        """result[r, c] = arr[r, (c + delta) mod C] -- one XLU lane rotation."""
        if delta % C == 0:
            return arr
        shift = (-delta) % C if roll_is_numpy else delta % C
        return pltpu.roll(arr, shift, axis=1)

    def kernel(x_ref, w2t_ref, b2_ref, pool_ref, expand_ref, o_ref):
        # x_ref: (G, HW, C) f32; pool_ref: (P, HW) f32; expand_ref: (HW, P) f32.

        # --- AdaptiveAvgPool2d(L) (uniform windows): per-fold (P,HW)@(HW,C) matmul,
        #     O(G) instead of the old O(G^2) block-diagonal form.  Kept f32. ---
        pooled_parts = [
            jnp.dot(pool_ref[...], x_ref[g], preferred_element_type=jnp.float32)
            for g in range(G)
        ]
        pooled = (pooled_parts[0] if G == 1
                  else jnp.concatenate(pooled_parts, axis=0))          # (R, C)

        # --- global branch: 1x1 Conv2d == one big-M matmul (M = G*P); bf16 operands,
        #     f32 accumulation ---
        y_global = jnp.dot(pooled.astype(jnp.bfloat16), w2t_ref[...],
                           preferred_element_type=jnp.float32) + b2_ref[...]   # (R, C)

        # --- local branch: Conv1d(1,1,K, pad=(K-1)//2, no bias) over the per-batch
        #     flattened (position, channel) sequence.  One lane roll per tap: the
        #     spill lanes coming from the previous/next pool position are merged via
        #     jnp.where BEFORE rotating.  Fold boundaries use modular masks. ---
        row = lax.broadcasted_iota(jnp.int32, (R, 1), 0)
        not_first = (row % P != 0).astype(jnp.float32)        # row has an in-fold r-1
        not_last = (row % P != P - 1).astype(jnp.float32)     # row has an in-fold r+1
        zrow = jnp.zeros((1, C), jnp.float32)
        prev_row = jnp.concatenate([zrow, pooled[:R - 1, :]], axis=0) * not_first
        next_row = jnp.concatenate([pooled[1:, :], zrow], axis=0) * not_last

        lane = lax.broadcasted_iota(jnp.int32, (R, C), 1)
        y_local = w1[pad] * pooled
        for d in range(1, pad + 1):
            # tap +d: channel c+d, spilling into the next position's low channels
            y_local = y_local + w1[pad + d] * lane_take(
                jnp.where(lane < d, next_row, pooled), d)
            # tap -d: channel c-d, spilling into the previous position's high channels
            y_local = y_local + w1[pad - d] * lane_take(
                jnp.where(lane >= C - d, prev_row, pooled), -d)

        # --- Hardsigmoid gates + blend ---
        def hs(v):
            return jnp.clip(v * (1.0 / 6.0) + 0.5, 0.0, 1.0)

        att = (1.0 - local_weight) * hs(y_global) + local_weight * hs(y_local)  # (R, C)

        # --- conv_transpose2d(ones(C,1,s,s), stride=s):
        #     channel sum as an XLU lane reduce (MXU stays free), then per-fold
        #     nearest-neighbour upsample via a tiny (HW,P)@(P,1) f32 matvec and the
        #     final gating multiply.  Output stays lane-dense (C on the lane axis). ---
        att_sum = jnp.sum(att, axis=1, keepdims=True)                           # (R, 1)
        for g in range(G):
            up = jnp.dot(expand_ref[...], att_sum[g * P:(g + 1) * P, :],
                         preferred_element_type=jnp.float32)                    # (HW, 1)
            o_ref[g] = (x_ref[g] * up).astype(o_ref.dtype)

    return kernel


def mcca_forward(x, w1, w2, b2, local_size=5, local_weight=0.5):
    B, C, H, Wd = x.shape
    L = local_size
    assert H == Wd and H % L == 0, "spatial dims must be equal and divisible by local_size"
    assert C % 128 == 0, "channel count must be lane aligned (conv2 hard-codes 512)"
    s = H // L
    P = L * L
    HW = H * Wd
    K = int(np.asarray(w1).reshape(-1).shape[0])

    G = _choose_group(B, HW, C)
    num_steps = B // G

    # --- single NCHW -> NHWC transpose; (B,H,W,C) -> (B,H*W,C) reshape is free ---
    # TODO(synk): on v5e these two wrapper transposes are roughly an extra HBM round
    # trip of x/out; fuse them by reading (C, HW) tiles via memory_space=pl.ANY and
    # transposing on the XLU in-kernel (and/or carrying x/out in bf16) if hot.
    x3d = jnp.transpose(x, (0, 2, 3, 1)).reshape(B, HW, C)

    # --- host-precomputed window-membership matrices for ONE batch (used O(G) times
    #     in-kernel; ~10 KiB each, DMA'd once per grid step) ---
    sp = np.arange(HW)
    win = (sp // Wd // s) * L + ((sp % Wd) // s)                     # window id per row
    onehot = (win[:, None] == np.arange(P)[None, :]).astype(np.float32)   # (HW, P)
    pool_mat = jnp.asarray(onehot.T / float(s * s))                  # (P, HW) f32
    expand_mat = jnp.asarray(onehot)                                 # (HW, P) f32

    w2t = jnp.asarray(w2).reshape(C, C).T.astype(jnp.bfloat16)       # bf16 halves the DMA
    # TODO(synk): per-output-channel int8 w2 on v5e/v6e (not v7x: no int MXU path).
    b2r = jnp.asarray(b2).reshape(1, C).astype(jnp.float32)

    kernel = make_mcca_kernel(w1, C, P, G, local_weight, _roll_matches_numpy())

    flops = B * (2 * P * HW * C        # pooling
                 + 2 * P * C * C       # conv2
                 + 2 * K * P * C       # local conv
                 + 8 * P * C           # gates / blend / channel sum
                 + 2 * HW * P          # upsample
                 + HW * C)             # final multiply
    bytes_accessed = (2 * B * HW * C * 4
                      + num_steps * (C * C * 2 + C * 4 + 2 * P * HW * 4))

    out3d = pl.pallas_call(
        kernel,
        out_shape=jax.ShapeDtypeStruct((B, HW, C), jnp.float32),
        grid_spec=pltpu.PrefetchScalarGridSpec(
            num_scalar_prefetch=0,
            grid=(num_steps,),
            in_specs=[
                pl.BlockSpec((G, HW, C), lambda i: (i, 0, 0)),   # G folded batches of x
                pl.BlockSpec((C, C), lambda i: (0, 0)),          # conv2 weight^T (bf16)
                pl.BlockSpec((1, C), lambda i: (0, 0)),          # conv2 bias
                pl.BlockSpec((P, HW), lambda i: (0, 0)),         # pooling matrix (1 batch)
                pl.BlockSpec((HW, P), lambda i: (0, 0)),         # upsample matrix (1 batch)
            ],
            out_specs=pl.BlockSpec((G, HW, C), lambda i: (i, 0, 0)),
        ),
        compiler_params=pltpu.CompilerParams(
            dimension_semantics=("parallel",)),                  # v7x: 2 TCs split the grid
        cost_estimate=pl.CostEstimate(
            flops=int(flops), transcendentals=0,
            bytes_accessed=int(bytes_accessed)),
    )(x3d, w2t, b2r, pool_mat, expand_mat)

    # --- single NHWC -> NCHW transpose on the way out ---
    return jnp.transpose(out3d.reshape(B, H, Wd, C), (0, 3, 1, 2))


def mcca_reference(x, w1, w2, b2, local_size=5, local_weight=0.5):
    """Pure-JAX reference mirroring the PyTorch forward."""
    B, C, H, W = x.shape
    L = local_size
    s = H // L
    K = int(np.asarray(w1).reshape(-1).shape[0])
    pad = (K - 1) // 2
    pooled = x.reshape(B, C, L, s, L, s).mean(axis=(3, 5))                    # (B,C,L,L)
    temp = jnp.transpose(pooled.reshape(B, C, L * L), (0, 2, 1)).reshape(B, L * L * C)
    seq = jnp.pad(temp, ((0, 0), (pad, pad)))
    y_local = jnp.zeros((B, L * L * C), jnp.float32)
    for t in range(K):
        y_local = y_local + w1[t] * seq[:, t:t + L * L * C]
    y_global = jnp.einsum('bcij,oc->boij', pooled, w2.reshape(C, C),
                          precision=lax.Precision.HIGHEST) + b2[None, :, None, None]
    hs = lambda v: jnp.clip(v / 6.0 + 0.5, 0.0, 1.0)
    att_local = hs(jnp.transpose(y_local.reshape(B, L * L, C), (0, 2, 1)).reshape(B, C, L, L))
    att_global = hs(y_global)
    comb = att_global * (1.0 - local_weight) + att_local * local_weight
    att_sum = comb.sum(axis=1)                                                # (B, L, L)
    att_up = jnp.repeat(jnp.repeat(att_sum, s, axis=1), s, axis=2)            # (B, H, W)
    return x * att_up[:, None, :, :]


if __name__ == "__main__":
    B, C, H, W = 2, 512, 10, 10    # conv2 in the torch module hard-codes 512 channels
    L, lw = 5, 0.5
    gamma, b_param = 2, 1
    t = int(abs(math.log(C, 2) + b_param) / gamma)
    K = t if t % 2 else t + 1      # -> k = 5 for C = 512

    key = jax.random.PRNGKey(0)
    k1, k2, k3, k4 = jax.random.split(key, 4)
    x = jax.random.normal(k1, (B, C, H, W), jnp.float32)
    w1 = np.asarray(jax.random.normal(k2, (K,), jnp.float32) * 0.3)           # conv1 weight (1,1,k)
    w2 = jax.random.normal(k3, (C, C), jnp.float32) * 0.05                    # conv2 weight (C,C,1,1)
    b2 = jax.random.normal(k4, (C,), jnp.float32) * 0.05                      # conv2 bias

    out = jax.block_until_ready(mcca_forward(x, w1, w2, b2, L, lw))
    ref = mcca_reference(x, jnp.asarray(w1), w2, b2, L, lw)

    assert out.shape == x.shape
    rel_err = float(jnp.max(jnp.abs(out - ref)) / (jnp.max(jnp.abs(ref)) + 1e-8))
    assert rel_err < 1e-3, f"relative error too large: {rel_err}"
    print("KERNEL_OK")
</pallas_src>

<mosaic_0001>
module attributes {stable_mosaic.version = 11 : i64} {
  func.func @probe(%arg0: memref<8x128xf32, #tpu.memory_space<vmem>>, %arg1: memref<8x128xf32, #tpu.memory_space<vmem>>) attributes {dimension_semantics = [], scalar_prefetch = 0 : i64, scratch_operands = 0 : i64, tpu.core_type = #tpu.core_type<tc>} {
    %c0 = arith.constant 0 : index
    %c0_0 = arith.constant 0 : index
    %0 = vector.load %arg0[%c0, %c0_0] : memref<8x128xf32, #tpu.memory_space<vmem>>, vector<8x128xf32>
    %c1_i32 = arith.constant 1 : i32
    %1 = tpu.dynamic_rotate %0 by %c1_i32 dim 1 : vector<8x128xf32>, i32 -> vector<8x128xf32>
    %c0_1 = arith.constant 0 : index
    %c0_2 = arith.constant 0 : index
    %2 = vector.load %arg1[%c0_1, %c0_2] : memref<8x128xf32, #tpu.memory_space<vmem>>, vector<8x128xf32>
    tpu.vector_store %arg1[%c0_1, %c0_2], %1 {strides = array<i32>} : memref<8x128xf32, #tpu.memory_space<vmem>>, vector<8x128xf32>,
    return
  }
}

</mosaic_0001>

<bundles_post_ra>
// kernel: tpu_custom_call.1
= control target key start
LH: loop header
LB: loop body
LE: loop exit
PB: predicated region body
PF: predicated region fallthrough
CT: control target
= control target key end

     0   :  { %6 = vsyncpa [#allocation3], 0  ;;  %s106_s0 = inlined_call_operand.hbm [shape: f32[8,128], index: 0, kind: input, shape index: {}]   ;;  %s107_s1 = inlined_call_operand.hbm [shape: f32[8,128], index: 1, kind: output, shape index: {}]  }
   0x1   :  { %7 = vsyncpa [#allocation4], 0  ;;  %s87_s6 = smov [#allocation2]  }
   0x2   :  { %s14_s7 = sshll.u32 %s87_s6, 4  ;;  %s15_s7 = int_to_ptr.vmem [resolvable:$true] %s14_s7 }
   0x3   :  { %s51_s8 = scalar_lea.vmem %s15_s7, 128  ;;  %p56_p1 = scmp.lt.s32.totalorder %s15_s7, %s15_s7 }
   0x4   :  { %p52_p0 = scmp.ne.s32.totalorder %s15_s7, %s51_s8  ;;  %p57_p2 = scmp.lt.s32.totalorder %s51_s8, %s51_s8 }
   0x6   :  { %p58_p3 = por %p57_p2, %p56_p1 }
   0x8   :  { %p59_p4 = pnand %p58_p3, %p52_p0 }
   0xa   :  { %62 = shalt.err (!%p59_p4)
}
   0xb   :  { %17 = dma.hbm_to_vmem [thread:$0]  %s106_s0, 128, %s15_s7, [#allocation3]  }
   0xc   :  { %83 = dma.done.wait [#allocation3], 128  }
   0xd   :  { %84 = vsyncadd [#allocation3], 4294967168  ;;  %v21_v0 = vld [vmem:[#allocation2] sm:$0xff]  ;;  %s88_s11 = smov 1   ;;  %s89_s12 = smov [#allocation5]  }
   0xe   :  { %22 = vrot.lane.b32.xlu0 %v21_v0, %s88_s11  ;;  %s31_s13 = sshll.u32 %s89_s12, 4  ;;  %s32_s13 = int_to_ptr.vmem [resolvable:$true] %s31_s13 }
   0xf   :  { %s63_s14 = scalar_lea.vmem %s32_s13, 128  ;;  %p68_p6 = scmp.lt.s32.totalorder %s32_s13, %s32_s13 }
  0x10   :  { %p64_p5 = scmp.ne.s32.totalorder %s32_s13, %s63_s14  ;;  %p69_p7 = scmp.lt.s32.totalorder %s63_s14, %s63_s14 }
  0x12   :  { %p70_p8 = por %p69_p7, %p68_p6 }
  0x14   :  { %p71_p9 = pnand %p70_p8, %p64_p5 }
  0x80   :  { %v23_v1 = vpop.permute.xlu0 %22 }
  0x81   :  { %24 = vst [vmem:[#allocation5] sm:$0xff] %v23_v1 }
  0x82   :  { %74 = shalt.err (!%p71_p9)
}
  0x83   :  { %34 = dma.vmem_to_hbm [thread:$0]  %s32_s13, 128, %s107_s1, [#allocation4]  }
  0x84   :  { %85 = dma.done.wait [#allocation4], 128  }
  0x85   :  { %86 = vsyncadd [#allocation4], 4294967168 }
  0x86   :  { %38 = vsyncpa [#allocation3], 1 }
  0x87   :  { %39 = vsyncpa [#allocation4], 1 }

</bundles_post_ra>
